<compile_context>
chip_gen: v7x
topology: tpu7x:2x2x1
jax: 0.10.0
libtpu: 0.0.40
codegen_flags: <defaults>
</compile_context>

<pallas_src>
import functools

import numpy as np
import jax
import jax.numpy as jnp
from jax.experimental import pallas as pl
from jax.experimental.pallas import tpu as pltpu


_TARGET_BLOCK_ELEMS = 512 * 1024        # mask elements (1 byte each) per grid step
_VMEM_LIMIT_BYTES = 32 * 1024 * 1024    # safe scoped limit on v5e/v6e/v7x
# TODO(synk): on v5e/v6e (128 MiB physical VMEM) raise _TARGET_BLOCK_ELEMS to
# 1-2 MiB and _VMEM_LIMIT_BYTES to 64 MiB for ~10-15% less per-step overhead.


def _choose_block_b(B, H, W):
    per_img = max(1, H * W)
    return int(max(1, min(B, _TARGET_BLOCK_ELEMS // per_img)))


def _make_count_kernel(use_diagonals: bool, block_b: int, batch_total: int):
    """Counts (active pixel, inactive in-bounds neighbor) pairs in one
    (block_b, H, W) slab of independent images."""
    tail = batch_total % block_b   # static; != 0 iff the last block overruns B

    def kernel(mask_ref, out_ref):
        raw = mask_ref[...]                              # (block_b, H, W)
        bb, H, W = raw.shape
        active = raw if raw.dtype == jnp.bool_ else (raw != 0)

        if tail:
            # cdiv grid: the last block's out-of-range batch rows hold garbage
            # (Pallas does not zero-fill partial blocks) -> mask them out.
            # This code is only emitted when block_b does not divide B.
            nvalid = jnp.where(pl.program_id(0) == pl.num_programs(0) - 1,
                               tail, bb)
            rows = jax.lax.broadcasted_iota(jnp.int32, (bb, H, W), 0)
            active = jnp.logical_and(active, rows < nvalid)

        m = jnp.where(active, jnp.int32(1), jnp.int32(0))   # {0,1}, int32

        # ---- narrow boundary sums: O(bb*(H+W)) work -------------------------
        s_all = jnp.sum(m)
        edges = (jnp.sum(m[:, 0:1, :]) + jnp.sum(m[:, H - 1:H, :])
                 + jnp.sum(m[:, :, 0:1]) + jnp.sum(m[:, :, W - 1:W]))

        # ---- active-active adjacent-pair counts (bulk work) -----------------
        p_h = jnp.int32(0)
        p_v = jnp.int32(0)
        p_d = jnp.int32(0)
        if W >= 2:
            a = m[:, :, 1:]            # single lane-realigned slice, shared below
            b = m[:, :, :W - 1]
            p_h = jnp.sum(a * b)                           # horizontal pairs
        if H >= 2:
            p_v = jnp.sum(m[:, 1:, :] * m[:, :H - 1, :])   # vertical pairs

        if use_diagonals:              # dense path: 8-neighborhood
            corners = (jnp.sum(m[:, 0:1, 0:1]) + jnp.sum(m[:, 0:1, W - 1:W])
                       + jnp.sum(m[:, H - 1:H, 0:1])
                       + jnp.sum(m[:, H - 1:H, W - 1:W]))
            if W >= 2 and H >= 2:
                p_d = jnp.sum(a[:, 1:, :] * b[:, :H - 1, :]       # down-right
                              + a[:, :H - 1, :] * b[:, 1:, :])    # down-left
            total = 8 * s_all - 3 * edges + corners - 2 * (p_h + p_v + p_d)
        else:                          # tile path: 4-neighborhood
            total = 4 * s_all - edges - 2 * (p_h + p_v)

        out_ref[...] = jnp.broadcast_to(total, out_ref.shape)

    return kernel


@functools.partial(jax.jit, static_argnames=("use_diagonals", "block_b"))
def _partial_counts(mask_nchw, use_diagonals, block_b):
    """mask_nchw: bool (N, C, H, W). Returns (num_chunks,) int32 partial counts."""
    N, C, H, W = mask_nchw.shape
    B = N * C
    assert block_b * H * W <= (2 ** 31 - 1) // 8, \
        "per-chunk int32 partial count could overflow; needs spatial tiling"
    # Free reshape of contiguous leading dims; bool mask goes straight into the
    # kernel (no wrapper-side astype(int8) / jnp.pad HBM passes).
    flat = mask_nchw.reshape(B, H, W)
    num_chunks = (B + block_b - 1) // block_b
    out = pl.pallas_call(
        _make_count_kernel(use_diagonals, block_b, B),
        out_shape=jax.ShapeDtypeStruct((num_chunks, 1, 128), jnp.int32),
        grid=(num_chunks,),
        in_specs=[pl.BlockSpec((block_b, H, W), lambda i: (i, 0, 0))],
        # Lane-dense (1, 1, 128) output row per chunk -> unmasked stores.
        out_specs=pl.BlockSpec((1, 1, 128), lambda i: (i, 0, 0)),
        compiler_params=pltpu.CompilerParams(
            # Independent partial sums: "parallel" lets megacore parts (v7x)
            # shard chunks across both TensorCores.
            dimension_semantics=("parallel",),
            vmem_limit_bytes=_VMEM_LIMIT_BYTES),
    )(flat)
    return out[:, 0, 0]


class LoggingLayer:
    id = 1

    def __init__(self, name='', enabled=False):
        self.name = name
        self.enabled = enabled
        self.added_id = False

    def enable_logging(self):
        self.enabled = True

    def disable_logging(self):
        self.enabled = False

    def get(self):
        pass

    def reset(self):
        pass

    def reset_history(self):
        pass


class PrevInBandwidthLogger(LoggingLayer):
    n_read = 0
    _pending = []   # [(device int32 partial-count vector, multiplier)]

    def __init__(self, **kwargs):
        super().__init__(**kwargs)

    def reset(self):
        PrevInBandwidthLogger.n_read = 0
        PrevInBandwidthLogger._pending = []

    def forward(self, mask, dilation: str, tile_size: int = 0):
        # mask: (N, C, H, W) bool jnp array
        if not self.added_id:
            self.name = f'{LoggingLayer.id} {self.name}'
            LoggingLayer.id += 1
            self.added_id = True
        if self.enabled:
            if dilation == 'tile':
                ts = tile_size if tile_size > 0 else mask.shape[2] // -tile_size
                mask = mask[:, :, ::ts, ::ts]
                N, C, H, W = mask.shape
                partials = _partial_counts(mask, use_diagonals=False,
                                           block_b=_choose_block_b(N * C, H, W))
                PrevInBandwidthLogger._pending.append((partials, ts))
            else:
                N, C, H, W = mask.shape
                partials = _partial_counts(mask, use_diagonals=True,
                                           block_b=_choose_block_b(N * C, H, W))
                PrevInBandwidthLogger._pending.append((partials, 1))
        return mask

    __call__ = forward

    @staticmethod
    def _flush():
        # The per-call host sync (.item()) of the PyTorch module is deferred to
        # get(): forward() only enqueues device-side partial counts.
        pending, PrevInBandwidthLogger._pending = PrevInBandwidthLogger._pending, []
        for partials, mult in pending:
            PrevInBandwidthLogger.n_read += \
                int(np.asarray(partials).astype(np.int64).sum()) * int(mult)

    def get(self):
        PrevInBandwidthLogger._flush()
        return PrevInBandwidthLogger.n_read


def _ref_count(mask_bool_np, use_diagonals):
    """Pure-numpy reference mirroring the PyTorch slice-adds."""
    inv = (~mask_bool_np).astype(np.int64)
    nb = np.zeros_like(inv)
    nb[:, :, :-1] += inv[:, :, 1:]
    nb[:, :, 1:] += inv[:, :, :-1]
    nb[:, :, :, :-1] += inv[:, :, :, 1:]
    nb[:, :, :, 1:] += inv[:, :, :, :-1]
    if use_diagonals:
        nb[:, :, :-1, :-1] += inv[:, :, 1:, 1:]
        nb[:, :, 1:, :-1] += inv[:, :, :-1, 1:]
        nb[:, :, :-1, 1:] += inv[:, :, 1:, :-1]
        nb[:, :, 1:, 1:] += inv[:, :, :-1, :-1]
    nb[~mask_bool_np] = 0
    return int(nb.sum())


if __name__ == "__main__":
    k1, k2 = jax.random.split(jax.random.PRNGKey(0))
    N, C, H, W = 2, 4, 16, 16
    mask = jax.random.bernoulli(k1, 0.5, (N, C, H, W))   # bool NCHW

    logger = PrevInBandwidthLogger(name="prev_in_bw", enabled=False)
    logger.enable_logging()
    logger.reset()

    # Dense (8-neighborhood) path.
    out_mask = logger.forward(mask, dilation="dense")
    out_mask = jax.block_until_ready(out_mask)
    jax.block_until_ready(PrevInBandwidthLogger._pending[-1][0])   # kernel result
    dense_read = logger.get()

    # Tile (4-neighborhood, subsampled) path; negative tile_size exercised.
    tile_mask = logger.forward(mask, dilation="tile", tile_size=-4)  # ts = 16//4 = 4
    tile_mask = jax.block_until_ready(tile_mask)
    total_read = logger.get()

    # Cross-check against the PyTorch-equivalent numpy reference.
    mask_np = np.asarray(mask)
    ts = 16 // 4
    ref_dense = _ref_count(mask_np, use_diagonals=True)
    ref_tile = _ref_count(mask_np[:, :, ::ts, ::ts], use_diagonals=False) * ts
    assert dense_read == ref_dense, (dense_read, ref_dense)
    assert total_read == ref_dense + ref_tile, (total_read, ref_dense + ref_tile)
    assert out_mask.shape == (N, C, H, W)
    assert tile_mask.shape == (N, C, H // ts, W // ts)

    # Multi-chunk + partial tail block path: B = 3*11 = 33 images of 128x128 ->
    # block_b = 32, grid = 2, last block has 1 valid row (in-kernel row mask).
    logger.reset()
    mask2 = jax.random.bernoulli(k2, 0.3, (3, 11, 128, 128))
    out2 = jax.block_until_ready(logger.forward(mask2, dilation="dense"))
    jax.block_until_ready(PrevInBandwidthLogger._pending[-1][0])
    got2 = logger.get()
    ref2 = _ref_count(np.asarray(mask2), use_diagonals=True)
    assert got2 == ref2, (got2, ref2)
    assert out2.shape == (3, 11, 128, 128)

    print("KERNEL_OK")
</pallas_src>

<mosaic_0001>
module attributes {stable_mosaic.version = 11 : i64} {
  func.func @kernel(%arg0: i32, %arg1: memref<8x16x16xi32, #tpu.memory_space<vmem>>, %arg2: memref<1x1x128xi32, #tpu.memory_space<vmem>>) attributes {dimension_semantics = [#tpu.dimension_semantics<parallel>], iteration_bounds = array<i64: 1>, scalar_prefetch = 0 : i64, scratch_operands = 0 : i64, tpu.core_type = #tpu.core_type<tc>, window_params = [{transform_indices = @transform_0, window_bounds = array<i64: 8, 16, 16>}, {transform_indices = @transform_1, window_bounds = array<i64: 1, 1, 128>}]} {
    %c0 = arith.constant 0 : index
    %c0_0 = arith.constant 0 : index
    %c0_1 = arith.constant 0 : index
    %0 = vector.load %arg1[%c0, %c0_0, %c0_1] : memref<8x16x16xi32, #tpu.memory_space<vmem>>, vector<8x16x16xi32>
    %cst = arith.constant dense<0> : vector<8x16x16xi32>
    %1 = arith.cmpi ne, %0, %cst : vector<8x16x16xi32>
    %c1_i32 = arith.constant 1 : i32
    %c0_i32 = arith.constant 0 : i32
    %2 = vector.broadcast %c1_i32 : i32 to vector<8x16x16xi32>
    %3 = vector.broadcast %c0_i32 : i32 to vector<8x16x16xi32>
    %4 = arith.select %1, %2, %3 : vector<8x16x16xi1>, vector<8x16x16xi32>
    %5 = vector.shape_cast %4 : vector<8x16x16xi32> to vector<1x8x16x16xi32>
    %cst_2 = arith.constant dense<0> : vector<1xi32>
    %6 = vector.multi_reduction <add>, %5, %cst_2 [1, 2, 3] : vector<1x8x16x16xi32> to vector<1xi32>
    %7 = vector.shape_cast %6 : vector<1xi32> to vector<1x1x1x1xi32>
    %8 = vector.extract %7[0, 0, 0, 0] : i32 from vector<1x1x1x1xi32>
    %9 = vector.extract_strided_slice %4 {offsets = [0, 0, 0], sizes = [8, 1, 16], strides = [1, 1, 1]} : vector<8x16x16xi32> to vector<8x1x16xi32>
    %10 = vector.shape_cast %9 : vector<8x1x16xi32> to vector<1x8x1x16xi32>
    %cst_3 = arith.constant dense<0> : vector<1xi32>
    %11 = vector.multi_reduction <add>, %10, %cst_3 [1, 2, 3] : vector<1x8x1x16xi32> to vector<1xi32>
    %12 = vector.shape_cast %11 : vector<1xi32> to vector<1x1x1x1xi32>
    %13 = vector.extract %12[0, 0, 0, 0] : i32 from vector<1x1x1x1xi32>
    %14 = vector.extract_strided_slice %4 {offsets = [0, 15, 0], sizes = [8, 1, 16], strides = [1, 1, 1]} : vector<8x16x16xi32> to vector<8x1x16xi32>
    %15 = vector.shape_cast %14 : vector<8x1x16xi32> to vector<1x8x1x16xi32>
    %cst_4 = arith.constant dense<0> : vector<1xi32>
    %16 = vector.multi_reduction <add>, %15, %cst_4 [1, 2, 3] : vector<1x8x1x16xi32> to vector<1xi32>
    %17 = vector.shape_cast %16 : vector<1xi32> to vector<1x1x1x1xi32>
    %18 = vector.extract %17[0, 0, 0, 0] : i32 from vector<1x1x1x1xi32>
    %19 = arith.addi %13, %18 : i32
    %20 = vector.extract_strided_slice %4 {offsets = [0, 0, 0], sizes = [8, 16, 1], strides = [1, 1, 1]} : vector<8x16x16xi32> to vector<8x16x1xi32>
    %21 = vector.shape_cast %20 : vector<8x16x1xi32> to vector<1x8x16x1xi32>
    %cst_5 = arith.constant dense<0> : vector<1xi32>
    %22 = vector.multi_reduction <add>, %21, %cst_5 [1, 2, 3] : vector<1x8x16x1xi32> to vector<1xi32>
    %23 = vector.shape_cast %22 : vector<1xi32> to vector<1x1x1x1xi32>
    %24 = vector.extract %23[0, 0, 0, 0] : i32 from vector<1x1x1x1xi32>
    %25 = arith.addi %19, %24 : i32
    %26 = vector.extract_strided_slice %4 {offsets = [0, 0, 15], sizes = [8, 16, 1], strides = [1, 1, 1]} : vector<8x16x16xi32> to vector<8x16x1xi32>
    %27 = vector.shape_cast %26 : vector<8x16x1xi32> to vector<1x8x16x1xi32>
    %cst_6 = arith.constant dense<0> : vector<1xi32>
    %28 = vector.multi_reduction <add>, %27, %cst_6 [1, 2, 3] : vector<1x8x16x1xi32> to vector<1xi32>
    %29 = vector.shape_cast %28 : vector<1xi32> to vector<1x1x1x1xi32>
    %30 = vector.extract %29[0, 0, 0, 0] : i32 from vector<1x1x1x1xi32>
    %31 = arith.addi %25, %30 : i32
    %32 = vector.extract_strided_slice %4 {offsets = [0, 0, 1], sizes = [8, 16, 15], strides = [1, 1, 1]} : vector<8x16x16xi32> to vector<8x16x15xi32>
    %33 = vector.extract_strided_slice %4 {offsets = [0, 0, 0], sizes = [8, 16, 15], strides = [1, 1, 1]} : vector<8x16x16xi32> to vector<8x16x15xi32>
    %34 = arith.muli %32, %33 : vector<8x16x15xi32>
    %35 = vector.shape_cast %34 : vector<8x16x15xi32> to vector<1x8x16x15xi32>
    %cst_7 = arith.constant dense<0> : vector<1xi32>
    %36 = vector.multi_reduction <add>, %35, %cst_7 [1, 2, 3] : vector<1x8x16x15xi32> to vector<1xi32>
    %37 = vector.shape_cast %36 : vector<1xi32> to vector<1x1x1x1xi32>
    %38 = vector.extract %37[0, 0, 0, 0] : i32 from vector<1x1x1x1xi32>
    %39 = vector.extract_strided_slice %4 {offsets = [0, 1, 0], sizes = [8, 15, 16], strides = [1, 1, 1]} : vector<8x16x16xi32> to vector<8x15x16xi32>
    %40 = vector.extract_strided_slice %4 {offsets = [0, 0, 0], sizes = [8, 15, 16], strides = [1, 1, 1]} : vector<8x16x16xi32> to vector<8x15x16xi32>
    %41 = arith.muli %39, %40 : vector<8x15x16xi32>
    %42 = vector.shape_cast %41 : vector<8x15x16xi32> to vector<1x8x15x16xi32>
    %cst_8 = arith.constant dense<0> : vector<1xi32>
    %43 = vector.multi_reduction <add>, %42, %cst_8 [1, 2, 3] : vector<1x8x15x16xi32> to vector<1xi32>
    %44 = vector.shape_cast %43 : vector<1xi32> to vector<1x1x1x1xi32>
    %45 = vector.extract %44[0, 0, 0, 0] : i32 from vector<1x1x1x1xi32>
    %46 = vector.extract_strided_slice %4 {offsets = [0, 0, 0], sizes = [8, 1, 1], strides = [1, 1, 1]} : vector<8x16x16xi32> to vector<8x1x1xi32>
    %47 = vector.shape_cast %46 : vector<8x1x1xi32> to vector<1x8x1x1xi32>
    %cst_9 = arith.constant dense<0> : vector<1xi32>
    %48 = vector.multi_reduction <add>, %47, %cst_9 [1, 2, 3] : vector<1x8x1x1xi32> to vector<1xi32>
    %49 = vector.shape_cast %48 : vector<1xi32> to vector<1x1x1x1xi32>
    %50 = vector.extract %49[0, 0, 0, 0] : i32 from vector<1x1x1x1xi32>
    %51 = vector.extract_strided_slice %4 {offsets = [0, 0, 15], sizes = [8, 1, 1], strides = [1, 1, 1]} : vector<8x16x16xi32> to vector<8x1x1xi32>
    %52 = vector.shape_cast %51 : vector<8x1x1xi32> to vector<1x8x1x1xi32>
    %cst_10 = arith.constant dense<0> : vector<1xi32>
    %53 = vector.multi_reduction <add>, %52, %cst_10 [1, 2, 3] : vector<1x8x1x1xi32> to vector<1xi32>
    %54 = vector.shape_cast %53 : vector<1xi32> to vector<1x1x1x1xi32>
    %55 = vector.extract %54[0, 0, 0, 0] : i32 from vector<1x1x1x1xi32>
    %56 = arith.addi %50, %55 : i32
    %57 = vector.extract_strided_slice %4 {offsets = [0, 15, 0], sizes = [8, 1, 1], strides = [1, 1, 1]} : vector<8x16x16xi32> to vector<8x1x1xi32>
    %58 = vector.shape_cast %57 : vector<8x1x1xi32> to vector<1x8x1x1xi32>
    %cst_11 = arith.constant dense<0> : vector<1xi32>
    %59 = vector.multi_reduction <add>, %58, %cst_11 [1, 2, 3] : vector<1x8x1x1xi32> to vector<1xi32>
    %60 = vector.shape_cast %59 : vector<1xi32> to vector<1x1x1x1xi32>
    %61 = vector.extract %60[0, 0, 0, 0] : i32 from vector<1x1x1x1xi32>
    %62 = arith.addi %56, %61 : i32
    %63 = vector.extract_strided_slice %4 {offsets = [0, 15, 15], sizes = [8, 1, 1], strides = [1, 1, 1]} : vector<8x16x16xi32> to vector<8x1x1xi32>
    %64 = vector.shape_cast %63 : vector<8x1x1xi32> to vector<1x8x1x1xi32>
    %cst_12 = arith.constant dense<0> : vector<1xi32>
    %65 = vector.multi_reduction <add>, %64, %cst_12 [1, 2, 3] : vector<1x8x1x1xi32> to vector<1xi32>
    %66 = vector.shape_cast %65 : vector<1xi32> to vector<1x1x1x1xi32>
    %67 = vector.extract %66[0, 0, 0, 0] : i32 from vector<1x1x1x1xi32>
    %68 = arith.addi %62, %67 : i32
    %69 = vector.extract_strided_slice %32 {offsets = [0, 1, 0], sizes = [8, 15, 15], strides = [1, 1, 1]} : vector<8x16x15xi32> to vector<8x15x15xi32>
    %70 = vector.extract_strided_slice %33 {offsets = [0, 0, 0], sizes = [8, 15, 15], strides = [1, 1, 1]} : vector<8x16x15xi32> to vector<8x15x15xi32>
    %71 = arith.muli %69, %70 : vector<8x15x15xi32>
    %72 = vector.extract_strided_slice %32 {offsets = [0, 0, 0], sizes = [8, 15, 15], strides = [1, 1, 1]} : vector<8x16x15xi32> to vector<8x15x15xi32>
    %73 = vector.extract_strided_slice %33 {offsets = [0, 1, 0], sizes = [8, 15, 15], strides = [1, 1, 1]} : vector<8x16x15xi32> to vector<8x15x15xi32>
    %74 = arith.muli %72, %73 : vector<8x15x15xi32>
    %75 = arith.addi %71, %74 : vector<8x15x15xi32>
    %76 = vector.shape_cast %75 : vector<8x15x15xi32> to vector<1x8x15x15xi32>
    %cst_13 = arith.constant dense<0> : vector<1xi32>
    %77 = vector.multi_reduction <add>, %76, %cst_13 [1, 2, 3] : vector<1x8x15x15xi32> to vector<1xi32>
    %78 = vector.shape_cast %77 : vector<1xi32> to vector<1x1x1x1xi32>
    %79 = vector.extract %78[0, 0, 0, 0] : i32 from vector<1x1x1x1xi32>
    %c8_i32 = arith.constant 8 : i32
    %80 = arith.muli %c8_i32, %8 : i32
    %c3_i32 = arith.constant 3 : i32
    %81 = arith.muli %c3_i32, %31 : i32
    %82 = arith.subi %80, %81 : i32
    %83 = arith.addi %82, %68 : i32
    %84 = arith.addi %38, %45 : i32
    %85 = arith.addi %84, %79 : i32
    %c2_i32 = arith.constant 2 : i32
    %86 = arith.muli %c2_i32, %85 : i32
    %87 = arith.subi %83, %86 : i32
    %88 = vector.broadcast %87 : i32 to vector<1x1x128xi32>
    %c0_14 = arith.constant 0 : index
    %c0_15 = arith.constant 0 : index
    %c0_16 = arith.constant 0 : index
    %89 = vector.load %arg2[%c0_14, %c0_15, %c0_16] : memref<1x1x128xi32, #tpu.memory_space<vmem>>, vector<1x1x128xi32>
    tpu.vector_store %arg2[%c0_14, %c0_15, %c0_16], %88 {strides = array<i32>} : memref<1x1x128xi32, #tpu.memory_space<vmem>>, vector<1x1x128xi32>,
    return
  }
  func.func @transform_0(%arg0: i32) -> (i32, i32, i32) {
    %c0_i32 = arith.constant 0 : i32
    %c0_i32_0 = arith.constant 0 : i32
    %c0_i32_1 = arith.constant 0 : i32
    return %arg0, %c0_i32, %c0_i32_0 : i32, i32, i32
  }
  func.func @transform_1(%arg0: i32) -> (i32, i32, i32) {
    %c0_i32 = arith.constant 0 : i32
    %c0_i32_0 = arith.constant 0 : i32
    %c0_i32_1 = arith.constant 0 : i32
    return %arg0, %c0_i32, %c0_i32_0 : i32, i32, i32
  }
}

</mosaic_0001>

<bundles_post_ra>
// kernel: _partial_counts.1
= control target key start
LH: loop header
LB: loop body
LE: loop exit
PB: predicated region body
PF: predicated region fallthrough
CT: control target
= control target key end

     0   :  { %vm665_vm0 = vcmask 1046528   ;;  %v906_v6 = vmov 0   ;;  %s907_s28 = smov 1   ;;  %s1606_s0 = inlined_call_operand.vmem [shape: s32[8,16,16], index: 0, kind: input, shape index: {}]   ;;  %s1607_s1 = inlined_call_operand.hbm [shape: s32[1,1,128], index: 1, kind: output, shape index: {}]  }
   0x1   :  { %v12_v0 = vld [vmem:[%s1606_s0 + $0x18] sm:$0xff]  ;;  %v10_v1 = vld [vmem:[%s1606_s0 + $0x8] sm:$0xff]  ;;  %v11_v2 = vld [vmem:[%s1606_s0 + $0x10] sm:$0xff] }
   0x2   :  { %vm28_vm1 = vcmp.ne.s32.totalorder %v12_v0, 0  ;;  %vm26_vm2 = vcmp.ne.s32.totalorder %v10_v1, 0  ;;  %vm27_vm3 = vcmp.ne.s32.totalorder %v11_v2, 0  ;;  %v9_v3 = vld [vmem:[%s1606_s0] sm:$0xff]  ;;  %v14_v4 = vld [vmem:[%s1606_s0 + $0x28] sm:$0xff]  ;;  %v16_v10 = vld [vmem:[%s1606_s0 + $0x38] sm:$0xff] }
   0x3   :  { %v13_v5 = vld [vmem:[%s1606_s0 + $0x20] sm:$0xff]  ;;  %v938_v7 = vsel %vm28_vm1, 1, %v906_v6  ;;  %v941_v8 = vsel %vm26_vm2, 1, %v906_v6  ;;  %v944_v9 = vsel %vm27_vm3, 1, %v906_v6  ;;  %vm25_vm4 = vcmp.ne.s32.totalorder %v9_v3, 0  ;;  %v15_v15 = vld [vmem:[%s1606_s0 + $0x30] sm:$0xff] }
   0x4   :  { %v670_v11 = vrot.slane %v938_v7, 1  ;;  %v667_v12 = vrot.slane %v941_v8, 1  ;;  %v669_v13 = vrot.slane %v944_v9, 1  ;;  %v953_v14 = vsel %vm25_vm4, 1, %v906_v6  ;;  %v18_v16 = vld [vmem:[%s1606_s0 + $0x48] sm:$0xff]  ;;  %v17_v18 = vld [vmem:[%s1606_s0 + $0x40] sm:$0xff] }
   0x5   :  { %v666_v17 = vrot.slane %v953_v14, 1  ;;  %vm30_vm5 = vcmp.ne.s32.totalorder %v14_v4, 0  ;;  %vm29_vm6 = vcmp.ne.s32.totalorder %v13_v5, 0  ;;  %vm32_vm7 = vcmp.ne.s32.totalorder %v16_v10, 0  ;;  %v20_v19 = vld [vmem:[%s1606_s0 + $0x58] sm:$0xff] }
   0x6   :  { %696 = vrot.lane.b32.xlu1 %v670_v11, %s907_s28  ;;  %692 = vrot.lane.b32.xlu0 %v667_v12, %s907_s28  ;;  %v671_v20 = vsel %vm665_vm0, %v669_v13, %v670_v11  ;;  %v972_v21 = vsel %vm30_vm5, 1, %v906_v6  ;;  %v975_v22 = vsel %vm29_vm6, 1, %v906_v6  ;;  %v978_v23 = vsel %vm32_vm7, 1, %v906_v6 }
   0x7   :  { %v668_v24 = vsel %vm665_vm0, %v666_v17, %v667_v12  ;;  %v673_v25 = vrot.slane %v972_v21, 1  ;;  %v672_v26 = vrot.slane %v975_v22, 1  ;;  %v676_v27 = vrot.slane %v978_v23, 1 }
   0x8   :  { %vm31_vm8 = vcmp.ne.s32.totalorder %v15_v15, 0  ;;  %vm34_vm9 = vcmp.ne.s32.totalorder %v18_v16, 0  ;;  %vm33_vm10 = vcmp.ne.s32.totalorder %v17_v18, 0  ;;  %vm36_vm11 = vcmp.ne.s32.totalorder %v20_v19, 0 }
   0x9   :  { %6 = vsyncpa [#allocation3], 0  ;;  %v985_v28 = vsel %vm31_vm8, 1, %v906_v6  ;;  %v988_v29 = vsel %vm34_vm9, 1, %v906_v6  ;;  %v991_v30 = vsel %vm33_vm10, 1, %v906_v6  ;;  %v19_v31 = vld [vmem:[%s1606_s0 + $0x50] sm:$0xff]  ;;  %v674_v36 = vsel %vm665_vm0, %v672_v26, %v673_v25 }
   0xa   :  { %694 = vrot.lane.b32.xlu1 %v671_v20, %s907_s28  ;;  %690 = vrot.lane.b32.xlu0 %v668_v24, %s907_s28  ;;  %v675_v32 = vrot.slane %v985_v28, 1  ;;  %v679_v33 = vrot.slane %v988_v29, 1  ;;  %v678_v34 = vrot.slane %v991_v30, 1  ;;  %v1002_v35 = vsel %vm36_vm11, 1, %v906_v6  ;;  %v21_v16 = vld [vmem:[%s1606_s0 + $0x60] sm:$0xff]  ;;  %v22_v17 = vld [vmem:[%s1606_s0 + $0x68] sm:$0xff] }
   0xb   :  { %v383_v37 = vrot.slane %v953_v14, 7  ;;  %v682_v39 = vrot.slane %v1002_v35, 1  ;;  %vm35_vm12 = vcmp.ne.s32.totalorder %v19_v31, 0  ;;  %vm423_vm13 = vcmask 130049   ;;  %v23_v18 = vld [vmem:[%s1606_s0 + $0x70] sm:$0xff]  ;;  %v24_v19 = vld [vmem:[%s1606_s0 + $0x78] sm:$0xff] }
   0xc   :  { %v677_v38 = vsel %vm665_vm0, %v675_v32, %v676_v27  ;;  %v680_v40 = vsel %vm665_vm0, %v678_v34, %v679_v33  ;;  %vm382_vm14 = vcmask 1040384   ;;  %v384_v42 = vrot.slane %v941_v8, 7  ;;  %s908_s26 = smov [#allocation2]  }
   0xd   :  { %v407_v41 = vmul.u32 %v383_v37, %v953_v14  ;;  %v386_v43 = vrot.slane %v944_v9, 7  ;;  %v387_v44 = vrot.slane %v938_v7, 7  ;;  %v389_v45 = vrot.slane %v975_v22, 7  ;;  %s845_s27 = sshll.u32 %s908_s26, 4  ;;  %s846_s27 = int_to_ptr.vmem [resolvable:$true] %s845_s27 }
   0xe   :  { %700 = vrot.lane.b32.xlu1 %v673_v25, %s907_s28  ;;  %698 = vrot.lane.b32.xlu0 %v674_v36, %s907_s28  ;;  %v390_v46 = vrot.slane %v972_v21, 7  ;;  %v1018_v47 = vsel %vm35_vm12, 1, %v906_v6  ;;  %vm57_vm15 = vcmask 130048   ;;  %v385_v48 = vsel %vm382_vm14, %v383_v37, %v384_v42  ;;  %s882_s8 = scalar_lea.vmem %s846_s27, 16  ;;  %s886_s9 = scalar_lea.vmem %s846_s27, 32 }
   0xf   :  { %v1022_v49 = vrot.slane %v985_v28, 7  ;;  %v424_v50 = vsel %vm423_vm13, %v407_v41, 0  ;;  %v408_v51 = vmul.u32 %v385_v48, %v941_v8  ;;  %v409_v52 = vmul.u32 %v386_v43, %v944_v9  ;;  %p883_p0 = scmp.ne.s32.totalorder %s846_s27, %s882_s8  ;;  %p887_p1 = scmp.lt.s32.totalorder %s846_s27, %s846_s27 }
  0x10   :  { %v388_v53 = vsel %vm382_vm14, %v386_v43, %v387_v44  ;;  %v411_v55 = vmul.u32 %v389_v45, %v975_v22  ;;  %v391_v56 = vsel %vm382_vm14, %v389_v45, %v390_v46  ;;  %v393_v57 = vrot.slane %v978_v23, 7  ;;  %p888_p2 = scmp.lt.s32.totalorder %s886_s9, %s882_s8 }
  0x11   :  { %v410_v54 = vmul.u32 %v388_v53, %v938_v7  ;;  %v425_v58 = vsel %vm57_vm15, %v408_v51, 0  ;;  %v426_v59 = vsel %vm423_vm13, %v409_v52, 0  ;;  %v412_v60 = vmul.u32 %v391_v56, %v972_v21 }
  0x12   :  { %704 = vrot.lane.b32.xlu1 %v676_v27, %s907_s28  ;;  %702 = vrot.lane.b32.xlu0 %v677_v38, %s907_s28  ;;  %v413_v61 = vmul.u32 %v1022_v49, %v985_v28  ;;  %v681_v62 = vrot.slane %v1018_v47, 1  ;;  %v428_v0 = vsel %vm423_vm13, %v411_v55, 0  ;;  %v394_v1 = vsel %vm382_vm14, %v1022_v49, %v393_v57  ;;  %p889_p3 = por %p888_p2, %p887_p1 }
  0x13   :  { %v427_v63 = vsel %vm57_vm15, %v410_v54, 0  ;;  %v1044_v2 = vadd.s32 %v428_v0, %v424_v50  ;;  %v430_v3 = vsel %vm57_vm15, %v412_v60, 0  ;;  %v414_v5 = vmul.u32 %v394_v1, %v978_v23 }
  0x14   :  { %v432_v4 = vsel %vm423_vm13, %v413_v61, 0  ;;  %v1049_v10 = vadd.s32 %v430_v3, %v425_v58  ;;  %v683_v13 = vsel %vm665_vm0, %v681_v62, %v682_v39  ;;  %vm37_vm1 = vcmp.ne.s32.totalorder %v21_v16, 0  ;;  %p890_p4 = pnand %p889_p3, %p883_p0 }
  0x15   :  { %v1051_v11 = vadd.s32 %v432_v4, %v426_v59  ;;  %v434_v12 = vsel %vm57_vm15, %v414_v5, 0  ;;  %vm38_vm2 = vcmp.ne.s32.totalorder %v22_v17, 0  ;;  %v1092_v20 = vsel %vm37_vm1, 1, %v906_v6 }
  0x16   :  { %708 = vrot.lane.b32.xlu1 %v679_v33, %s907_s28  ;;  %706 = vrot.lane.b32.xlu0 %v680_v40, %s907_s28  ;;  %v435_v15 = vadd.s32 %v434_v12, %v427_v63  ;;  %v1095_v24 = vsel %vm38_vm2, 1, %v906_v6  ;;  %vm39_vm3 = vcmp.ne.s32.totalorder %v23_v18, 0  ;;  %v395_v25 = vrot.slane %v991_v30, 7 }
  0x17   :  { %v396_v26 = vrot.slane %v988_v29, 7  ;;  %vm40_vm4 = vcmp.ne.s32.totalorder %v24_v19, 0  ;;  %v398_v27 = vrot.slane %v1018_v47, 7  ;;  %v399_v31 = vrot.slane %v1002_v35, 7 }
  0x18   :  { %v684_v32 = vrot.slane %v1092_v20, 1  ;;  %v685_v33 = vrot.slane %v1095_v24, 1  ;;  %v1106_v34 = vsel %vm39_vm3, 1, %v906_v6  ;;  %v1109_v36 = vsel %vm40_vm4, 1, %v906_v6 }
  0x19   :  { %v1113_v38 = vrot.slane %v1092_v20, 7  ;;  %v400_v41 = vsel %vm382_vm14, %v398_v27, %v399_v31  ;;  %v1119_v42 = vrot.slane %v1106_v34, 7  ;;  %v688_v46 = vrot.slane %v1109_v36, 1 }
  0x1a   :  { %712 = vrot.lane.b32.xlu1 %v682_v39, %s907_s28  ;;  %710 = vrot.lane.b32.xlu0 %v683_v13, %s907_s28  ;;  %v402_v39 = vrot.slane %v1095_v24, 7  ;;  %v418_v6 = vmul.u32 %v400_v41, %v1002_v35  ;;  %v686_v44 = vsel %vm665_vm0, %v684_v32, %v685_v33  ;;  %v59_v18 = vsel %vm57_vm15, %v941_v8, 0 }
  0x1b   :  { %v419_v60 = vmul.u32 %v1113_v38, %v1092_v20  ;;  %v421_v62 = vmul.u32 %v1119_v42, %v1106_v34  ;;  %v62_v19 = vsel %vm57_vm15, %v975_v22, 0  ;;  %v66_v31 = vsel %vm57_vm15, %v985_v28, 0 }
  0x1c   :  { %v403_v50 = vsel %vm382_vm14, %v1113_v38, %v402_v39  ;;  %v442_v54 = vsel %vm57_vm15, %v418_v6, 0  ;;  %v68_v32 = vsel %vm57_vm15, %v978_v23, 0  ;;  %v74_v6 = vsel %vm57_vm15, %v1018_v47, 0 }
  0x1d   :  { %v420_v52 = vmul.u32 %v403_v50, %v1095_v24  ;;  %v443_v59 = vadd.s32 %v442_v54, %v435_v15  ;;  %v448_v12 = vsel %vm423_vm13, %v421_v62, 0  ;;  %v82_v54 = vsel %vm57_vm15, %v1106_v34, 0 }
  0x1e   :  { %285 = vrot.lane.b32.xlu1 %v941_v8, %s907_s28  ;;  %283 = vrot.lane.b32.xlu0 %v953_v14, %s907_s28  ;;  %vm143_vm5 = vcmask 130055   ;;  %vm179_vm6 = vcmask 7168   ;;  %vm231_vm7 = vcmask 130168   ;;  %vm509_vm8 = vcmask 123000  }
  0x1f   :  { %v446_v61 = vsel %vm57_vm15, %v420_v52, 0  ;;  %v78_v52 = vsel %vm57_vm15, %v1092_v20, 0  ;;  %vm545_vm9 = vcmask 7175   ;;  %vm778_vm10 = vcmask 130057  }
  0x20   :  { %vm331_vm11 = vcmask 130056   ;;  %vm474_vm12 = vcmask 0  }
  0x22   :  { %289 = vrot.lane.b32.xlu1 %v938_v7, %s907_s28  ;;  %287 = vrot.lane.b32.xlu0 %v944_v9, %s907_s28 }
  0x26   :  { %293 = vrot.lane.b32.xlu1 %v972_v21, %s907_s28  ;;  %291 = vrot.lane.b32.xlu0 %v975_v22, %s907_s28 }
  0x2a   :  { %297 = vrot.lane.b32.xlu1 %v978_v23, %s907_s28  ;;  %295 = vrot.lane.b32.xlu0 %v985_v28, %s907_s28 }
  0x2e   :  { %617 = vrot.lane.b32.xlu0 %v383_v37, %s907_s28  ;;  %619 = vrot.lane.b32.xlu1 %v385_v48, %s907_s28  ;;  %v397_v37 = vsel %vm382_vm14, %v395_v25, %v396_v26  ;;  %v415_v48 = vmul.u32 %v395_v25, %v991_v30  ;;  %v60_v26 = vsel %vm57_vm15, %v944_v9, 0 }
  0x2f   :  { %v416_v40 = vmul.u32 %v397_v37, %v988_v29  ;;  %v67_v39 = vadd.s32 %v66_v31, %v60_v26  ;;  %v190_v26 = vsel %vm179_vm6, %v978_v23, 0 }
  0x30   :  { %v436_v57 = vsel %vm423_vm13, %v415_v48, 0 }
  0x31   :  { %v438_v51 = vsel %vm57_vm15, %v416_v40, 0  ;;  %v437_v3 = vadd.s32 %v436_v57, %v1044_v2  ;;  %v75_v48 = vadd.s32 %v74_v6, %v67_v39 }
  0x32   :  { %621 = vrot.lane.b32.xlu0 %v386_v43, %s907_s28  ;;  %623 = vrot.lane.b32.xlu1 %v388_v53, %s907_s28  ;;  %v405_v43 = vrot.slane %v1109_v36, 7  ;;  %v417_v53 = vmul.u32 %v398_v27, %v1018_v47  ;;  %v439_v58 = vadd.s32 %v438_v51, %v1049_v10  ;;  %v444_v10 = vsel %vm423_vm13, %v419_v60, 0 }
  0x33   :  { %v445_v13 = vadd.s32 %v444_v10, %v437_v3  ;;  %v146_v3 = vsel %vm143_vm5, %v972_v21, 0  ;;  %v150_v10 = vsel %vm143_vm5, %v1002_v35, 0 }
  0x34   :  { %v440_v63 = vsel %vm423_vm13, %v417_v53, 0  ;;  %v80_v53 = vsel %vm57_vm15, %v1095_v24, 0  ;;  %vm581_vm13 = vcmask 130175  }
  0x35   :  { %v441_v5 = vadd.s32 %v440_v63, %v1051_v11  ;;  %v58_v11 = vsel %vm57_vm15, %v953_v14, 0 }
  0x36   :  { %625 = vrot.lane.b32.xlu0 %v389_v45, %s907_s28  ;;  %627 = vrot.lane.b32.xlu1 %v391_v56, %s907_s28  ;;  %v687_v45 = vrot.slane %v1106_v34, 1 }
  0x37   :  { %v449_v15 = vadd.s32 %v448_v12, %v441_v5  ;;  %v148_v5 = vsel %vm143_vm5, %v988_v29, 0  ;;  %v152_v12 = vsel %vm143_vm5, %v1095_v24, 0 }
  0x38   :  { %v689_v56 = vsel %vm665_vm0, %v687_v45, %v688_v46  ;;  %vm108_vm0 = vcmask 122880  }
  0x39   :  { %v111_v60 = vsel %vm108_vm0, %v975_v22, 0  ;;  %v117_v62 = vsel %vm108_vm0, %v1092_v20, 0  ;;  %v119_v63 = vsel %vm108_vm0, %v1106_v34, 0 }
  0x3a   :  { %629 = vrot.lane.b32.xlu0 %v1022_v49, %s907_s28  ;;  %631 = vrot.lane.b32.xlu1 %v394_v1, %s907_s28  ;;  %v1136_v49 = vsel %vm382_vm14, %v1119_v42, %v405_v43  ;;  %v447_v1 = vadd.s32 %v446_v61, %v439_v58  ;;  %v72_v43 = vsel %vm57_vm15, %v988_v29, 0  ;;  %v109_v58 = vsel %vm108_vm0, %v953_v14, 0 }
  0x3b   :  { %v422_v55 = vmul.u32 %v1136_v49, %v1109_v36  ;;  %v112_v61 = vsel %vm108_vm0, %v985_v28, 0 }
  0x3c   :  { %v452_v16 = vadd.s32 %v447_v1, %v445_v13  ;;  %v145_v1 = vsel %vm143_vm5, %v938_v7, 0  ;;  %v154_v13 = vsel %vm143_vm5, %v1109_v36, 0 }
  0x3d   :  { %v450_v0 = vsel %vm57_vm15, %v422_v55, 0  ;;  %v84_v55 = vsel %vm57_vm15, %v1109_v36, 0  ;;  %v151_v39 = vadd.s32 %v150_v10, %v145_v1  ;;  %v204_v1 = vsel %vm179_vm6, %v1106_v34, 0 }
  0x3e   :  { %714 = vrot.lane.b32.xlu0 %v686_v44, %s907_s28  ;;  %716 = vrot.lane.b32.xlu1 %v685_v33, %s907_s28  ;;  %v451_v4 = vadd.s32 %v450_v0, %v443_v59  ;;  %v63_v33 = vadd.s32 %v62_v19, %v58_v11  ;;  %v76_v44 = vsel %vm57_vm15, %v1002_v35, 0  ;;  %v110_v59 = vsel %vm108_vm0, %v944_v9, 0 }
  0x3f   :  { %v144_v0 = vsel %vm143_vm5, %v941_v8, 0  ;;  %v183_v11 = vsel %vm179_vm6, %v938_v7, 0  ;;  %v186_v19 = vsel %vm179_vm6, %v972_v21, 0  ;;  %v240_v10 = vsel %vm231_vm7, %v985_v28, 0 }
  0x40   :  { %v453_v17 = vadd.s32 %v451_v4, %v449_v15  ;;  %v147_v4 = vsel %vm143_vm5, %v978_v23, 0  ;;  %v180_v15 = vsel %vm179_vm6, %v953_v14, 0 }
  0x42   :  { %718 = vrot.lane.b32.xlu0 %v689_v56, %s907_s28  ;;  %720 = vrot.lane.b32.xlu1 %v688_v46, %s907_s28  ;;  %v1168_v2 = vadd.s32 %v453_v17, %v452_v16  ;;  %v181_v16 = vsel %vm179_vm6, %v941_v8, 0  ;;  %v182_v17 = vsel %vm179_vm6, %v944_v9, 0 }
  0x43   :  { %v187_v6 = vadd.s32 %v186_v19, %v181_v16 }
  0x46   :  { %299 = vrot.lane.b32.xlu0 %v991_v30, %s907_s28  ;;  %301 = vrot.lane.b32.xlu1 %v988_v29, %s907_s28 }
  0x4a   :  { %303 = vrot.lane.b32.xlu0 %v1018_v47, %s907_s28  ;;  %305 = vrot.lane.b32.xlu1 %v1002_v35, %s907_s28 }
  0x4e   :  { %633 = vrot.lane.b32.xlu0 %v395_v25, %s907_s28  ;;  %635 = vrot.lane.b32.xlu1 %v397_v37, %s907_s28  ;;  %v64_v25 = vsel %vm57_vm15, %v972_v21, 0 }
  0x4f   :  { %v65_v37 = vadd.s32 %v64_v25, %v59_v18  ;;  %v184_v18 = vsel %vm179_vm6, %v975_v22, 0  ;;  %v188_v25 = vsel %vm179_vm6, %v985_v28, 0 }
  0x51   :  { %v73_v46 = vadd.s32 %v72_v43, %v65_v37  ;;  %v149_v37 = vadd.s32 %v148_v5, %v144_v0  ;;  %v185_v43 = vadd.s32 %v184_v18, %v180_v15  ;;  %v202_v0 = vsel %vm179_vm6, %v1095_v24, 0 }
  0x52   :  { %637 = vrot.lane.b32.xlu0 %v398_v27, %s907_s28  ;;  %639 = vrot.lane.b32.xlu1 %v400_v41, %s907_s28  ;;  %v61_v27 = vsel %vm57_vm15, %v938_v7, 0  ;;  %v70_v41 = vsel %vm57_vm15, %v991_v30, 0  ;;  %v235_v5 = vsel %vm231_vm7, %v938_v7, 0 }
  0x53   :  { %v69_v40 = vadd.s32 %v68_v32, %v61_v27  ;;  %v71_v45 = vadd.s32 %v70_v41, %v63_v33  ;;  %v81_v57 = vadd.s32 %v80_v53, %v73_v46  ;;  %v118_v32 = vadd.s32 %v117_v62, %v111_v60 }
  0x54   :  { %v120_v33 = vadd.s32 %v119_v63, %v112_v61  ;;  %v155_v41 = vadd.s32 %v154_v13, %v147_v4  ;;  %v192_v46 = vsel %vm179_vm6, %v991_v30, 0  ;;  %v200_v63 = vsel %vm179_vm6, %v1092_v20, 0 }
  0x55   :  { %v77_v51 = vadd.s32 %v76_v44, %v69_v40  ;;  %v79_v56 = vadd.s32 %v78_v52, %v71_v45  ;;  %v153_v40 = vadd.s32 %v152_v12, %v146_v3  ;;  %v189_v44 = vadd.s32 %v188_v25, %v182_v17 }
  0x56   :  { %307 = vrot.lane.b32.xlu0 %v1092_v20, %s907_s28  ;;  %309 = vrot.lane.b32.xlu1 %v1095_v24, %s907_s28  ;;  %v191_v45 = vadd.s32 %v190_v26, %v183_v11  ;;  %v198_v52 = vsel %vm179_vm6, %v1002_v35, 0  ;;  %v193_v61 = vadd.s32 %v192_v46, %v185_v43  ;;  %v238_v3 = vsel %vm231_vm7, %v972_v21, 0 }
  0x57   :  { %v86_v53 = vadd.s32 %v81_v57, %v79_v56  ;;  %v157_v60 = vadd.s32 %v155_v41, %v153_v40  ;;  %v206_v56 = vsel %vm179_vm6, %v1109_v36, 0  ;;  %v232_v57 = vsel %vm231_vm7, %v953_v14, 0 }
  0x58   :  { %v199_v62 = vadd.s32 %v198_v52, %v191_v45  ;;  %v234_v4 = vsel %vm231_vm7, %v944_v9, 0  ;;  %v242_v12 = vsel %vm231_vm7, %v978_v23, 0  ;;  %v201_v15 = vadd.s32 %v200_v63, %v193_v61 }
  0x59   :  { %v241_v25 = vadd.s32 %v240_v10, %v234_v4  ;;  %v243_v26 = vadd.s32 %v242_v12, %v235_v5  ;;  %v252_v52 = vsel %vm231_vm7, %v1092_v20, 0  ;;  %v510_v10 = vsel %vm509_vm8, %v953_v14, 0 }
  0x5a   :  { %311 = vrot.lane.b32.xlu0 %v1106_v34, %s907_s28  ;;  %313 = vrot.lane.b32.xlu1 %v1109_v36, %s907_s28  ;;  %v207_v11 = vadd.s32 %v206_v56, %v199_v62 }
  0x5e   :  { %641 = vrot.lane.b32.xlu0 %v1113_v38, %s907_s28  ;;  %643 = vrot.lane.b32.xlu1 %v403_v50, %s907_s28  ;;  %v83_v38 = vadd.s32 %v82_v54, %v75_v48  ;;  %v85_v50 = vadd.s32 %v84_v55, %v77_v51  ;;  %v194_v48 = vsel %vm179_vm6, %v988_v29, 0  ;;  %v196_v51 = vsel %vm179_vm6, %v1018_v47, 0 }
  0x60   :  { %v87_v54 = vadd.s32 %v85_v50, %v83_v38  ;;  %v233_v38 = vsel %vm231_vm7, %v941_v8, 0  ;;  %v236_v50 = vsel %vm231_vm7, %v975_v22, 0 }
  0x61   :  { %v237_v18 = vadd.s32 %v236_v50, %v232_v57  ;;  %v239_v19 = vadd.s32 %v238_v3, %v233_v38 }
  0x62   :  { %645 = vrot.lane.b32.xlu0 %v1119_v42, %s907_s28  ;;  %647 = vrot.lane.b32.xlu1 %v1136_v49, %s907_s28  ;;  %v113_v42 = vsel %vm108_vm0, %v991_v30, 0  ;;  %v115_v49 = vsel %vm108_vm0, %v1018_v47, 0  ;;  %v1301_v13 = vadd.s32 %v87_v54, %v86_v53  ;;  %v254_v53 = vsel %vm231_vm7, %v1095_v24, 0 }
  0x63   :  { %v114_v27 = vadd.s32 %v113_v42, %v109_v58  ;;  %v116_v31 = vadd.s32 %v115_v49, %v110_v59  ;;  %v122_v58 = vadd.s32 %v120_v33, %v118_v32  ;;  %v156_v59 = vadd.s32 %v151_v39, %v149_v37 }
  0x64   :  { %v195_v42 = vadd.s32 %v194_v48, %v187_v6  ;;  %v197_v49 = vadd.s32 %v196_v51, %v189_v44  ;;  %v248_v37 = vsel %vm231_vm7, %v1018_v47, 0  ;;  %v250_v39 = vsel %vm231_vm7, %v1002_v35, 0 }
  0x65   :  { %v121_v55 = vadd.s32 %v116_v31, %v114_v27  ;;  %v244_v27 = vsel %vm231_vm7, %v991_v30, 0  ;;  %v246_v31 = vsel %vm231_vm7, %v988_v29, 0  ;;  %v1309_v33 = vadd.s32 %v157_v60, %v156_v59 }
  0x66   :  { %v203_v16 = vadd.s32 %v202_v0, %v195_v42  ;;  %v205_v17 = vadd.s32 %v204_v1, %v197_v49  ;;  %v90_v40 = vshrl.u32 %v1301_v13, 16  ;;  %v245_v45 = vadd.s32 %v244_v27, %v237_v18 }
  0x67   :  { %v1307_v32 = vadd.s32 %v122_v58, %v121_v55  ;;  %v247_v46 = vadd.s32 %v246_v31, %v239_v19  ;;  %v249_v48 = vadd.s32 %v248_v37, %v241_v25  ;;  %v251_v51 = vadd.s32 %v250_v39, %v243_v26 }
  0x68   :  { %v208_v6 = vadd.s32 %v203_v16, %v201_v15  ;;  %v209_v44 = vadd.s32 %v207_v11, %v205_v17  ;;  %v160_v55 = vshrl.u32 %v1309_v33, 16  ;;  %v256_v58 = vsel %vm231_vm7, %v1106_v34, 0 }
  0x69   :  { %v125_v54 = vshrl.u32 %v1307_v32, 16  ;;  %v258_v59 = vsel %vm231_vm7, %v1109_v36, 0  ;;  %v92_v62 = vcvt.s32.f32 %v90_v40  ;;  %v253_v0 = vadd.s32 %v252_v52, %v245_v45 }
  0x6a   :  { %v1328_v63 = vadd.s32 %v209_v44, %v208_v6  ;;  %v255_v1 = vadd.s32 %v254_v53, %v247_v46  ;;  %v257_v38 = vadd.s32 %v256_v58, %v249_v48  ;;  %v259_v50 = vadd.s32 %v258_v59, %v251_v51 }
  0x6b   :  { %v127_v3 = vcvt.s32.f32 %v125_v54  ;;  %v162_v4 = vcvt.s32.f32 %v160_v55  ;;  %v89_v5 = vand.u32 65535, %v1301_v13  ;;  %v511_v25 = vsel %vm509_vm8, %v944_v9, 0 }
  0x6c   :  { %v212_v19 = vshrl.u32 %v1328_v63, 16  ;;  %v514_v13 = vsel %vm509_vm8, %v991_v30, 0  ;;  %v516_v26 = vsel %vm509_vm8, %v1018_v47, 0  ;;  %v260_v37 = vadd.s32 %v255_v1, %v253_v0 }
  0x6d   :  { %v261_v39 = vadd.s32 %v259_v50, %v257_v38  ;;  %v512_v40 = vsel %vm509_vm8, %v975_v22, 0  ;;  %v520_v6 = vsel %vm509_vm8, %v1106_v34, 0  ;;  %v91_v44 = vcvt.s32.f32 %v89_v5 }
  0x6e   :  { %v159_v48 = vand.u32 65535, %v1309_v33  ;;  %v124_v51 = vand.u32 65535, %v1307_v32  ;;  %v515_v52 = vadd.s32 %v514_v13, %v510_v10  ;;  %v517_v53 = vadd.s32 %v516_v26, %v511_v25 }
  0x6f   :  { %v214_v54 = vcvt.s32.f32 %v212_v19  ;;  %v1372_v59 = vadd.s32 %v261_v39, %v260_v37  ;;  %v548_v33 = vsel %vm545_vm9, %v972_v21, 0  ;;  %v549_v32 = vsel %vm545_vm9, %v978_v23, 0 }
  0x70   :  { %v556_v0 = vsel %vm545_vm9, %v1109_v36, 0  ;;  %v126_v38 = vcvt.s32.f32 %v124_v51  ;;  %v211_v50 = vand.u32 65535, %v1328_v63  ;;  %v456_v39 = vshrl.u32 %v1168_v2, 16 }
  0x71   :  { %v264_v5 = vshrl.u32 %v1372_v59, 16  ;;  %v557_v19 = vadd.s32 %v556_v0, %v549_v32 }
  0x72   :  { %v213_v26 = vcvt.s32.f32 %v211_v50 }
  0x73   :  { %v266_v37 = vcvt.s32.f32 %v264_v5 }
  0x78   :  { %v697_v41 = vpop.permute.xlu1 %696  ;;  %v693_v43 = vpop.permute.xlu0 %692 }
  0x79   :  { %v725_v60 = vmul.u32 %v697_v41, %v938_v7  ;;  %v723_v61 = vmul.u32 %v693_v43, %v941_v8  ;;  %v513_v41 = vsel %vm509_vm8, %v985_v28, 0  ;;  %v518_v43 = vsel %vm509_vm8, %v1092_v20, 0 }
  0x7a   :  { %v519_v55 = vadd.s32 %v518_v43, %v512_v40  ;;  %v521_v58 = vadd.s32 %v520_v6, %v513_v41 }
  0x7b   :  { %v742_v12 = vrot.slane %v725_v60, 7  ;;  %v739_v15 = vrot.slane %v723_v61, 7  ;;  %v546_v60 = vsel %vm545_vm9, %v941_v8, 0  ;;  %v547_v61 = vsel %vm545_vm9, %v938_v7, 0 }
  0x7c   :  { %v695_v42 = vpop.permute.xlu1 %694  ;;  %v691_v49 = vpop.permute.xlu0 %690 }
  0x7d   :  { %v724_v56 = vmul.u32 %v695_v42, %v944_v9  ;;  %v722_v57 = vmul.u32 %v691_v49, %v953_v14  ;;  %v550_v42 = vsel %vm545_vm9, %v988_v29, 0  ;;  %v552_v49 = vsel %vm545_vm9, %v1002_v35, 0 }
  0x7e   :  { %v551_v10 = vadd.s32 %v550_v42, %v546_v60 }
  0x7f   :  { %v1335_v16 = vrot.slane %v724_v56, 7  ;;  %v1337_v17 = vrot.slane %v722_v57, 7  ;;  %v161_v57 = vcvt.s32.f32 %v159_v48 }
  0x80   :  { %v1339_v11 = vpop.permute.xlu1 %700  ;;  %v1341_v18 = vpop.permute.xlu0 %698 }
  0x81   :  { %v1352_v27 = vsel %vm382_vm14, %v1337_v17, %v739_v15  ;;  %v1356_v31 = vsel %vm382_vm14, %v1335_v16, %v742_v12  ;;  %95 = vadd.xlane.f32.xlu0 %v92_v62  ;;  %v554_v62 = vsel %vm545_vm9, %v1095_v24, 0  ;;  %v553_v12 = vadd.s32 %v552_v49, %v547_v61 }
  0x82   :  { %v555_v15 = vadd.s32 %v554_v62, %v548_v33  ;;  %v455_v33 = vand.u32 65535, %v1168_v2  ;;  %v726_v50 = vmul.u32 %v1341_v18, %v975_v22 }
  0x83   :  { %v558_v40 = vadd.s32 %v553_v12, %v551_v10 }
  0x84   :  { %v1366_v45 = vpop.permute.xlu1 %704  ;;  %v1368_v46 = vpop.permute.xlu0 %702  ;;  %v559_v41 = vadd.s32 %v557_v19, %v555_v15  ;;  %v457_v49 = vcvt.s32.f32 %v455_v33  ;;  %v744_v15 = vrot.slane %v726_v50, 7 }
  0x85   :  { %165 = vadd.xlane.f32.xlu0 %v162_v4  ;;  %v523_v4 = vadd.s32 %v521_v58, %v519_v55  ;;  %v729_v19 = vmul.u32 %v1366_v45, %v978_v23 }
  0x86   :  { %130 = vadd.xlane.f32.xlu1 %v127_v3  ;;  %v522_v3 = vadd.s32 %v517_v53, %v515_v52  ;;  %v1405_v51 = vadd.s32 %v559_v41, %v558_v40 }
  0x88   :  { %v1390_v1 = vpop.permute.xlu1 %708  ;;  %v1392_v56 = vpop.permute.xlu0 %706  ;;  %v524_v63 = vadd.s32 %v523_v4, %v522_v3  ;;  %v562_v55 = vshrl.u32 %v1405_v51, 16 }
  0x89   :  { %217 = vadd.xlane.f32.xlu0 %v214_v54 }
  0x8a   :  { %93 = vadd.xlane.f32.xlu1 %v91_v44  ;;  %v458_v44 = vcvt.s32.f32 %v456_v39  ;;  %v526_v48 = vshrl.u32 %v524_v63, 16  ;;  %v564_v61 = vcvt.s32.f32 %v562_v55  ;;  %v525_v62 = vand.u32 65535, %v524_v63 }
  0x8c   :  { %v1396_v25 = vpop.permute.xlu1 %712  ;;  %v1398_v13 = vpop.permute.xlu0 %710  ;;  %v528_v54 = vcvt.s32.f32 %v526_v48  ;;  %v527_v3 = vcvt.s32.f32 %v525_v62 }
  0x8d   :  { %128 = vadd.xlane.f32.xlu0 %v126_v38  ;;  %v727_v38 = vmul.u32 %v1339_v11, %v972_v21 }
  0x8e   :  { %163 = vadd.xlane.f32.xlu1 %v161_v57 }
  0x8f   :  { %v745_v12 = vrot.slane %v727_v38, 7 }
  0x90   :  { %v1401_v43 = vpop.permute.xlu1 %285  ;;  %v1403_v6 = vpop.permute.xlu0 %283 }
  0x91   :  { %269 = vadd.xlane.f32.xlu0 %v266_v37  ;;  %v746_v45 = vsel %vm382_vm14, %v744_v15, %v745_v12 }
  0x92   :  { %215 = vadd.xlane.f32.xlu1 %v213_v26  ;;  %v728_v26 = vmul.u32 %v1368_v46, %v985_v28 }
  0x94   :  { %v1407_v52 = vpop.permute.xlu1 %289  ;;  %v1409_v53 = vpop.permute.xlu0 %287  ;;  %v747_v48 = vrot.slane %v728_v26, 7  ;;  %v476_v26 = vsel %vm474_vm12, %v944_v9, 0 }
  0x96   :  { %461 = vadd.xlane.f32.xlu1 %v458_v44  ;;  %v748_v44 = vrot.slane %v729_v19, 7 }
  0x98   :  { %v1412_v58 = vpop.permute.xlu1 %293  ;;  %v1414_v60 = vpop.permute.xlu0 %291 }
  0x9a   :  { %531 = vadd.xlane.f32.xlu1 %v528_v54 }
  0x9c   :  { %v1417_v32 = vpop.permute.xlu1 %297  ;;  %v1419_v42 = vpop.permute.xlu0 %295 }
  0x9e   :  { %567 = vadd.xlane.f32.xlu1 %v564_v61 }
  0xa0   :  { %v618_v0 = vpop.permute.xlu0 %617  ;;  %v620_v57 = vpop.permute.xlu1 %619 }
  0xa1   :  { %v649_v4 = vmul.u32 %v618_v0, %v953_v14  ;;  %v650_v2 = vmul.u32 %v620_v57, %v941_v8 }
  0xa2   :  { %459 = vadd.xlane.f32.xlu1 %v457_v49 }
  0xa3   :  { %v762_v11 = vadd.s32 %v1337_v17, %v649_v4  ;;  %v763_v18 = vadd.s32 %v1352_v27, %v650_v2  ;;  %v749_v4 = vsel %vm382_vm14, %v747_v48, %v748_v44  ;;  %v483_v44 = vsel %vm474_vm12, %v1092_v20, 0 }
  0xa4   :  { %v622_v5 = vpop.permute.xlu0 %621  ;;  %v624_v10 = vpop.permute.xlu1 %623 }
  0xa5   :  { %v651_v37 = vmul.u32 %v622_v5, %v944_v9  ;;  %v652_v46 = vmul.u32 %v624_v10, %v938_v7  ;;  %v779_v27 = vsel %vm778_vm10, %v762_v11, 0  ;;  %v780_v55 = vsel %vm331_vm11, %v763_v18, 0 }
  0xa6   :  { %529 = vadd.xlane.f32.xlu1 %v527_v3  ;;  %v477_v11 = vsel %vm474_vm12, %v975_v22, 0  ;;  %v478_v18 = vsel %vm474_vm12, %v985_v28, 0 }
  0xa7   :  { %v764_v61 = vadd.s32 %v1335_v16, %v651_v37  ;;  %v765_v2 = vadd.s32 %v1356_v31, %v652_v46  ;;  %v475_v16 = vsel %vm474_vm12, %v953_v14, 0 }
  0xa8   :  { %v626_v39 = vpop.permute.xlu0 %625  ;;  %v628_v63 = vpop.permute.xlu1 %627 }
  0xa9   :  { %v653_v40 = vmul.u32 %v626_v39, %v975_v22  ;;  %v654_v41 = vmul.u32 %v628_v63, %v972_v21  ;;  %v781_v31 = vsel %vm778_vm10, %v764_v61, 0  ;;  %v479_v63 = vsel %vm474_vm12, %v991_v30, 0 }
  0xab   :  { %v766_v54 = vadd.s32 %v744_v15, %v653_v40  ;;  %v767_v17 = vadd.s32 %v746_v45, %v654_v41  ;;  %v481_v41 = vsel %vm474_vm12, %v1018_v47, 0  ;;  %v782_v45 = vsel %vm331_vm11, %v765_v2, 0 }
  0xac   :  { %v630_v33 = vpop.permute.xlu0 %629  ;;  %v632_v49 = vpop.permute.xlu1 %631  ;;  %v482_v61 = vadd.s32 %v481_v41, %v476_v26  ;;  %v733_v2 = vmul.u32 %v1396_v25, %v1002_v35  ;;  %v315_v25 = vmul.u32 %v1403_v6, %v953_v14  ;;  %v1511_v14 = vsel %vm581_vm13, %v978_v23, 0 }
  0xad   :  { %v783_v62 = vsel %vm778_vm10, %v766_v54, 0  ;;  %v785_v0 = vsel %vm331_vm11, %v767_v17, 0  ;;  %v655_v57 = vmul.u32 %v630_v33, %v985_v28  ;;  %v656_v38 = vmul.u32 %v632_v49, %v978_v23 }
  0xae   :  { %v784_v50 = vadd.s32 %v783_v62, %v779_v27  ;;  %v786_v3 = vadd.s32 %v785_v0, %v780_v55  ;;  %v480_v55 = vadd.s32 %v479_v63, %v475_v16  ;;  %v484_v33 = vadd.s32 %v483_v44, %v477_v11 }
  0xaf   :  { %v768_v5 = vadd.s32 %v747_v48, %v655_v57  ;;  %v769_v10 = vadd.s32 %v749_v4, %v656_v38  ;;  %v485_v48 = vsel %vm474_vm12, %v1106_v34, 0  ;;  %v731_v38 = vmul.u32 %v1390_v1, %v988_v29 }
  0xb0   :  { %v792_v12 = vadd.s32 %v786_v3, %v784_v50  ;;  %v1449_v15 = vpop.permute.xlu0 %714  ;;  %v1451_v19 = vpop.permute.xlu1 %716  ;;  %v486_v49 = vadd.s32 %v485_v48, %v478_v18  ;;  %v730_v50 = vmul.u32 %v1392_v56, %v991_v30  ;;  %v487_v3 = vadd.s32 %v482_v61, %v480_v55 }
  0xb1   :  { %v787_v37 = vsel %vm778_vm10, %v768_v5, 0  ;;  %v789_v39 = vsel %vm331_vm11, %v769_v10, 0  ;;  %v732_v5 = vmul.u32 %v1398_v13, %v1018_v47  ;;  %v754_v18 = vrot.slane %v733_v2, 7 }
  0xb2   :  { %v788_v40 = vadd.s32 %v787_v37, %v781_v31  ;;  %v790_v54 = vadd.s32 %v789_v39, %v782_v45  ;;  %v488_v4 = vadd.s32 %v486_v49, %v484_v33  ;;  %v750_v26 = vrot.slane %v730_v50, 7 }
  0xb3   :  { %v753_v1 = vrot.slane %v732_v5, 7  ;;  %v316_v56 = vmul.u32 %v1401_v43, %v941_v8  ;;  %v1491_v31 = vsel %vm581_vm13, %v941_v8, 0  ;;  %v320_v13 = vmul.u32 %v1412_v58, %v972_v21 }
  0xb4   :  { %v794_v46 = vadd.s32 %v792_v12, %v788_v40  ;;  %v1471_v17 = vpop.permute.xlu0 %718  ;;  %v1473_v27 = vpop.permute.xlu1 %720  ;;  %v751_v12 = vrot.slane %v731_v38, 7  ;;  %v1485_v11 = vadd.s32 %v488_v4, %v487_v3  ;;  %v1499_v37 = vsel %vm581_vm13, %v938_v7, 0 }
  0xb5   :  { %v1503_v39 = vsel %vm581_vm13, %v972_v21, 0  ;;  %v319_v43 = vmul.u32 %v1414_v60, %v975_v22  ;;  %v322_v8 = vmul.u32 %v1417_v32, %v978_v23  ;;  %v1515_v6 = vsel %vm581_vm13, %v988_v29, 0 }
  0xb6   :  { %v796_v62 = vadd.s32 %v794_v46, %v790_v54  ;;  %v321_v21 = vmul.u32 %v1419_v42, %v985_v28  ;;  %v752_v22 = vsel %vm382_vm14, %v750_v26, %v751_v12  ;;  %v1523_v60 = vsel %vm581_vm13, %v1002_v35, 0 }
  0xb7   :  { %v333_v32 = vsel %vm331_vm11, %v316_v56, 0  ;;  %v318_v23 = vmul.u32 %v1407_v52, %v938_v7  ;;  %v317_v41 = vmul.u32 %v1409_v53, %v944_v9  ;;  %v755_v44 = vsel %vm382_vm14, %v753_v1, %v754_v18 }
  0xb8   :  { %v300_v0 = vpop.permute.xlu0 %299  ;;  %v1475_v57 = vpop.permute.xlu1 %301  ;;  %v332_v28 = vsel %vm331_vm11, %v315_v25, 0  ;;  %v338_v42 = vsel %vm331_vm11, %v320_v13, 0  ;;  %v336_v46 = vsel %vm331_vm11, %v319_v43, 0  ;;  %v342_v54 = vsel %vm331_vm11, %v322_v8, 0 }
  0xb9   :  { %v734_v55 = vmul.u32 %v1449_v15, %v1092_v20  ;;  %v323_v7 = vmul.u32 %v300_v0, %v991_v30  ;;  %v340_v53 = vsel %vm331_vm11, %v321_v21, 0  ;;  %v335_v38 = vsel %vm331_vm11, %v318_v23, 0 }
  0xba   :  { %v324_v61 = vmul.u32 %v1475_v57, %v988_v29  ;;  %v334_v50 = vsel %vm331_vm11, %v317_v41, 0  ;;  %v337_v0 = vadd.s32 %v336_v46, %v332_v28  ;;  %v343_v4 = vadd.s32 %v342_v54, %v335_v38 }
  0xbb   :  { %v341_v5 = vadd.s32 %v340_v53, %v334_v50  ;;  %v344_v57 = vsel %vm331_vm11, %v323_v7, 0  ;;  %v736_v13 = vmul.u32 %v1471_v17, %v1106_v34  ;;  %v590_v7 = vsel %vm581_vm13, %v1095_v24, 0 }
  0xbc   :  { %v304_v10 = vpop.permute.xlu0 %303  ;;  %v306_v16 = vpop.permute.xlu1 %305  ;;  %v346_v56 = vsel %vm331_vm11, %v324_v61, 0  ;;  %v345_v21 = vadd.s32 %v344_v57, %v337_v0 }
  0xbd   :  { %v325_v3 = vmul.u32 %v304_v10, %v1018_v47  ;;  %v326_v15 = vmul.u32 %v306_v16, %v1002_v35  ;;  %v756_v16 = vrot.slane %v734_v55, 7 }
  0xbf   :  { %v348_v43 = vsel %vm331_vm11, %v325_v3, 0  ;;  %v592_v3 = vsel %vm581_vm13, %v1109_v36, 0 }
  0xc0   :  { %v634_v63 = vpop.permute.xlu0 %633  ;;  %v636_v40 = vpop.permute.xlu1 %635 }
  0xc1   :  { %v657_v58 = vmul.u32 %v634_v63, %v991_v30  ;;  %v658_v45 = vmul.u32 %v636_v40, %v988_v29  ;;  %v339_v30 = vadd.s32 %v338_v42, %v333_v32 }
  0xc2   :  { %v735_v29 = vmul.u32 %v1451_v19, %v1095_v24  ;;  %v350_v19 = vsel %vm331_vm11, %v326_v15, 0  ;;  %v737_v40 = vmul.u32 %v1473_v27, %v1109_v36  ;;  %v759_v15 = vrot.slane %v736_v13, 7 }
  0xc3   :  { %v770_v48 = vadd.s32 %v750_v26, %v657_v58  ;;  %v771_v2 = vadd.s32 %v752_v22, %v658_v45  ;;  %v347_v58 = vadd.s32 %v346_v56, %v339_v30 }
  0xc4   :  { %v638_v52 = vpop.permute.xlu0 %637  ;;  %v640_v9 = vpop.permute.xlu1 %639  ;;  %v757_v23 = vrot.slane %v735_v29, 7  ;;  %v760_v30 = vrot.slane %v737_v40, 7 }
  0xc5   :  { %v791_v33 = vsel %vm778_vm10, %v770_v48, 0  ;;  %v659_v49 = vmul.u32 %v638_v52, %v1018_v47  ;;  %v793_v8 = vsel %vm331_vm11, %v771_v2, 0  ;;  %v351_v48 = vadd.s32 %v350_v19, %v343_v4 }
  0xc6   :  { %v798_v12 = vadd.s32 %v796_v62, %v791_v33  ;;  %v660_v62 = vmul.u32 %v640_v9, %v1002_v35  ;;  %v349_v35 = vadd.s32 %v348_v43, %v341_v5  ;;  %v758_v50 = vsel %vm382_vm14, %v756_v16, %v757_v23 }
  0xc7   :  { %v772_v25 = vadd.s32 %v753_v1, %v659_v49  ;;  %v587_v49 = vadd.s32 %v1515_v6, %v1491_v31  ;;  %v589_v31 = vadd.s32 %v1523_v60, %v1499_v37  ;;  %v491_v37 = vshrl.u32 %v1485_v11, 16 }
  0xc8   :  { %v308_v26 = vpop.permute.xlu0 %307  ;;  %v310_v18 = vpop.permute.xlu1 %309  ;;  %v800_v22 = vadd.s32 %v798_v12, %v793_v8  ;;  %v773_v54 = vadd.s32 %v755_v44, %v660_v62 }
  0xc9   :  { %v327_v47 = vmul.u32 %v308_v26, %v1092_v20  ;;  %v328_v10 = vmul.u32 %v310_v18, %v1095_v24  ;;  %v795_v41 = vsel %vm778_vm10, %v772_v25, 0  ;;  %v593_v26 = vadd.s32 %v592_v3, %v1511_v14 }
  0xca   :  { %v802_v52 = vadd.s32 %v800_v22, %v795_v41  ;;  %v797_v2 = vsel %vm331_vm11, %v773_v54, 0  ;;  %v594_v8 = vadd.s32 %v589_v31, %v587_v49  ;;  %v490_v41 = vand.u32 65535, %v1485_v11 }
  0xcb   :  { %v352_v63 = vsel %vm331_vm11, %v327_v47, 0  ;;  %v354_v1 = vsel %vm331_vm11, %v328_v10, 0  ;;  %v761_v10 = vsel %vm382_vm14, %v759_v15, %v760_v30 }
  0xcc   :  { %v312_v32 = vpop.permute.xlu0 %311  ;;  %v314_v17 = vpop.permute.xlu1 %313  ;;  %v353_v45 = vadd.s32 %v352_v63, %v345_v21  ;;  %v355_v46 = vadd.s32 %v354_v1, %v347_v58  ;;  %v804_v6 = vadd.s32 %v802_v52, %v797_v2 }
  0xcd   :  { %v329_v28 = vmul.u32 %v312_v32, %v1106_v34  ;;  %v330_v42 = vmul.u32 %v314_v17, %v1109_v36 }
  0xce   :  { %v360_v0 = vadd.s32 %v355_v46, %v353_v45  ;;  %v561_v45 = vand.u32 65535, %v1405_v51 }
  0xcf   :  { %v356_v55 = vsel %vm331_vm11, %v329_v28, 0  ;;  %v358_v27 = vsel %vm331_vm11, %v330_v42, 0 }
  0xd0   :  { %v357_v9 = vadd.s32 %v356_v55, %v349_v35  ;;  %v359_v53 = vadd.s32 %v358_v27, %v351_v48  ;;  %v642_v61 = vpop.permute.xlu0 %641  ;;  %v644_v33 = vpop.permute.xlu1 %643  ;;  %v492_v35 = vcvt.s32.f32 %v490_v41  ;;  %v563_v46 = vcvt.s32.f32 %v561_v45 }
  0xd1   :  { %v661_v38 = vmul.u32 %v642_v61, %v1092_v20  ;;  %v662_v44 = vmul.u32 %v644_v33, %v1095_v24  ;;  %v591_v24 = vadd.s32 %v590_v7, %v1503_v39 }
  0xd2   :  { %v361_v4 = vadd.s32 %v359_v53, %v357_v9 }
  0xd3   :  { %v774_v5 = vadd.s32 %v756_v16, %v661_v38  ;;  %v775_v29 = vadd.s32 %v758_v50, %v662_v44  ;;  %v595_v14 = vadd.s32 %v593_v26, %v591_v24 }
  0xd4   :  { %v646_v20 = vpop.permute.xlu0 %645  ;;  %v648_v57 = vpop.permute.xlu1 %647  ;;  %v362_v12 = vadd.s32 %v361_v4, %v360_v0 }
  0xd5   :  { %v799_v18 = vsel %vm778_vm10, %v774_v5, 0  ;;  %v663_v56 = vmul.u32 %v646_v20, %v1106_v34  ;;  %v664_v25 = vmul.u32 %v648_v57, %v1109_v36  ;;  %v801_v60 = vsel %vm331_vm11, %v775_v29, 0 }
  0xd6   :  { %v806_v47 = vadd.s32 %v804_v6, %v799_v18  ;;  %v364_v16 = vshrl.u32 %v362_v12, 16  ;;  %v493_v34 = vcvt.s32.f32 %v491_v37  ;;  %v263_v36 = vand.u32 65535, %v1372_v59 }
  0xd7   :  { %v776_v13 = vadd.s32 %v759_v15, %v663_v56  ;;  %v777_v43 = vadd.s32 %v761_v10, %v664_v25  ;;  %v596_v21 = vadd.s32 %v595_v14, %v594_v8  ;;  %v363_v23 = vand.u32 65535, %v362_v12 }
  0xd8   :  { %v807_v19 = vadd.s32 %v806_v47, %v801_v60  ;;  %v366_v39 = vcvt.s32.f32 %v364_v16  ;;  %v265_v58 = vcvt.s32.f32 %v263_v36 }
  0xd9   :  { %v803_v62 = vsel %vm778_vm10, %v776_v13, 0  ;;  %v805_v1 = vsel %vm331_vm11, %v777_v43, 0  ;;  %v597_v32 = vand.u32 65535, %v596_v21  ;;  %v365_v42 = vcvt.s32.f32 %v363_v23 }
  0xda   :  { %v808_v63 = vadd.s32 %v807_v19, %v803_v62  ;;  %369 = vadd.xlane.f32.xlu0 %v366_v39  ;;  %v598_v48 = vshrl.u32 %v596_v21, 16 }
  0xdb   :  { %v599_v28 = vcvt.s32.f32 %v597_v32 }
  0xdc   :  { %v809_v40 = vadd.s32 %v808_v63, %v805_v1  ;;  %v600_v59 = vcvt.s32.f32 %v598_v48 }
  0xde   :  { %496 = vadd.xlane.f32.xlu0 %v493_v34  ;;  %v811_v22 = vshrl.u32 %v809_v40, 16  ;;  %v810_v54 = vand.u32 65535, %v809_v40 }
  0xe0   :  { %v813_v17 = vcvt.s32.f32 %v811_v22  ;;  %v812_v55 = vcvt.s32.f32 %v810_v54 }
  0xe2   :  { %267 = vadd.xlane.f32.xlu0 %v265_v58  ;;  %816 = vadd.xlane.f32.xlu1 %v813_v17 }
  0xe6   :  { %367 = vadd.xlane.f32.xlu0 %v365_v42  ;;  %601 = vadd.xlane.f32.xlu1 %v599_v28 }
  0xea   :  { %494 = vadd.xlane.f32.xlu0 %v492_v35 }
  0xee   :  { %603 = vadd.xlane.f32.xlu0 %v600_v59 }
  0xf2   :  { %565 = vadd.xlane.f32.xlu0 %v563_v46 }
  0xf6   :  { %814 = vadd.xlane.f32.xlu0 %v812_v55 }
 0x10e   :  { %v96_v27 = vpop.xlane.xlu0 %95 }
 0x10f   :  { %v98_v7 = vcvt.f32.s32 %v96_v27 }
 0x111   :  { %v99_v53 = vshll.u32 %v98_v7, 16 }
 0x112   :  { %v166_v52 = vpop.xlane.xlu0 %165 }
 0x113   :  { %v131_v11 = vpop.xlane.xlu1 %130  ;;  %v168_v61 = vcvt.f32.s32 %v166_v52 }
 0x114   :  { %v133_v9 = vcvt.f32.s32 %v131_v11 }
 0x115   :  { %v169_v44 = vshll.u32 %v168_v61, 16 }
 0x116   :  { %v218_v33 = vpop.xlane.xlu0 %217  ;;  %v134_v50 = vshll.u32 %v133_v9, 16 }
 0x117   :  { %v94_v49 = vpop.xlane.xlu1 %93  ;;  %v220_v51 = vcvt.f32.s32 %v218_v33 }
 0x118   :  { %v97_v38 = vcvt.f32.s32 %v94_v49 }
 0x119   :  { %v221_v29 = vshll.u32 %v220_v51, 16 }
 0x11a   :  { %v100_v3 = vadd.s32 %v99_v53, %v97_v38  ;;  %v129_v15 = vpop.xlane.xlu0 %128 }
 0x11b   :  { %v164_v30 = vpop.xlane.xlu1 %163  ;;  %v132_v0 = vcvt.f32.s32 %v129_v15 }
 0x11c   :  { %v101_v4 = vrot.slane %v100_v3, 4  ;;  %v167_v2 = vcvt.f32.s32 %v164_v30 }
 0x11d   :  { %v135_v5 = vadd.s32 %v134_v50, %v132_v0 }
 0x11e   :  { %v170_v31 = vadd.s32 %v169_v44, %v167_v2  ;;  %v102_v6 = vadd.s32 %v101_v4, %v100_v3  ;;  %v270_v32 = vpop.xlane.xlu0 %269 }
 0x11f   :  { %v136_v20 = vrot.slane %v135_v5, 4  ;;  %v216_v57 = vpop.xlane.xlu1 %215  ;;  %v272_v55 = vcvt.f32.s32 %v270_v32 }
 0x120   :  { %v171_v12 = vrot.slane %v170_v31, 4  ;;  %v219_v24 = vcvt.f32.s32 %v216_v57  ;;  %v103_v26 = vrot.slane %v102_v6, 2 }
 0x121   :  { %v137_v18 = vadd.s32 %v136_v20, %v135_v5  ;;  %v273_v11 = vshll.u32 %v272_v55, 16 }
 0x122   :  { %v172_v56 = vadd.s32 %v171_v12, %v170_v31  ;;  %v222_v25 = vadd.s32 %v221_v29, %v219_v24  ;;  %v104_v47 = vadd.s32 %v103_v26, %v102_v6 }
 0x123   :  { %v138_v10 = vrot.slane %v137_v18, 2  ;;  %v462_v21 = vpop.xlane.xlu1 %461 }
 0x124   :  { %v223_v16 = vrot.slane %v222_v25, 4  ;;  %v105_v37 = vrot.slane %v104_v47, 1  ;;  %v173_v60 = vrot.slane %v172_v56, 2  ;;  %v464_v23 = vcvt.f32.s32 %v462_v21 }
 0x125   :  { %v139_v13 = vadd.s32 %v138_v10, %v137_v18 }
 0x126   :  { %v224_v43 = vadd.s32 %v223_v16, %v222_v25  ;;  %v106_v19 = vadd.s32 %v105_v37, %v104_v47  ;;  %v174_v39 = vadd.s32 %v173_v60, %v172_v56  ;;  %v465_v41 = vshll.u32 %v464_v23, 16 }
 0x127   :  { %v140_v8 = vrot.slane %v139_v13, 1  ;;  %v532_v58 = vpop.xlane.xlu1 %531 }
 0x128   :  { %855 = vpush %v106_v19  ;;  %v175_v14 = vrot.slane %v174_v39, 1  ;;  %v225_v62 = vrot.slane %v224_v43, 2  ;;  %v534_v28 = vcvt.f32.s32 %v532_v58 }
 0x129   :  { %v141_v63 = vadd.s32 %v140_v8, %v139_v13 }
 0x12a   :  { %v176_v34 = vadd.s32 %v175_v14, %v174_v39  ;;  %v226_v36 = vadd.s32 %v225_v62, %v224_v43  ;;  %v535_v59 = vshll.u32 %v534_v28, 16 }
 0x12b   :  { %857 = vpush %v141_v63  ;;  %v568_v22 = vpop.xlane.xlu1 %567 }
 0x12c   :  { %859 = vpush %v176_v34  ;;  %v227_v1 = vrot.slane %v226_v36, 1  ;;  %v570_v18 = vcvt.f32.s32 %v568_v22 }
 0x12e   :  { %v228_v40 = vadd.s32 %v227_v1, %v226_v36  ;;  %v571_v14 = vshll.u32 %v570_v18, 16 }
 0x12f   :  { %v460_v17 = vpop.xlane.xlu1 %459 }
 0x130   :  { %861 = vpush %v228_v40  ;;  %v463_v35 = vcvt.f32.s32 %v460_v17 }
 0x132   :  { %v466_v45 = vadd.s32 %v465_v41, %v463_v35 }
 0x133   :  { %v530_v48 = vpop.xlane.xlu1 %529 }
 0x134   :  { %v533_v54 = vcvt.f32.s32 %v530_v48  ;;  %v467_v27 = vrot.slane %v466_v45, 4 }
 0x136   :  { %v536_v7 = vadd.s32 %v535_v59, %v533_v54  ;;  %v468_v33 = vadd.s32 %v467_v27, %v466_v45 }
 0x138   :  { %v537_v49 = vrot.slane %v536_v7, 4  ;;  %v469_v5 = vrot.slane %v468_v33, 2 }
 0x13a   :  { %v538_v4 = vadd.s32 %v537_v49, %v536_v7  ;;  %v470_v47 = vadd.s32 %v469_v5, %v468_v33 }
 0x13c   :  { %v539_v10 = vrot.slane %v538_v4, 2  ;;  %v471_v34 = vrot.slane %v470_v47, 1 }
 0x13e   :  { %v540_v36 = vadd.s32 %v539_v10, %v538_v4 }
 0x140   :  { %v541_v35 = vrot.slane %v540_v36, 1 }
 0x159   :  { %s856_s0 = spop %855 }
 0x15a   :  { %s853_s28 = sshll.u32 %s856_s0, 3 }
 0x15c   :  { %s858_s10 = spop %857 }
 0x15d   :  { %s860_s11 = spop %859 }
 0x15e   :  { %s178_s14 = sadd.s32 %s860_s11, %s858_s10 }
 0x161   :  { %s862_s12 = spop %861 }
 0x162   :  { %s230_s17 = sadd.s32 %s862_s12, %s178_s14 }
 0x167   :  { %v370_v42 = vpop.xlane.xlu0 %369 }
 0x168   :  { %v372_v9 = vcvt.f32.s32 %v370_v42  ;;  %v472_v42 = vadd.s32 %v471_v34, %v470_v47 }
 0x16a   :  { %v373_v50 = vshll.u32 %v372_v9, 16 }
 0x16b   :  { %v497_v46 = vpop.xlane.xlu0 %496 }
 0x16c   :  { %v499_v44 = vcvt.f32.s32 %v497_v46 }
 0x16e   :  { %v500_v29 = vshll.u32 %v499_v44, 16 }
 0x16f   :  { %v268_v52 = vpop.xlane.xlu0 %267  ;;  %v817_v51 = vpop.xlane.xlu1 %816 }
 0x170   :  { %v271_v53 = vcvt.f32.s32 %v268_v52  ;;  %v819_v62 = vcvt.f32.s32 %v817_v51  ;;  %v542_v52 = vadd.s32 %v541_v35, %v540_v36 }
 0x172   :  { %v274_v61 = vadd.s32 %v273_v11, %v271_v53  ;;  %v820_v41 = vshll.u32 %v819_v62, 16 }
 0x173   :  { %v368_v38 = vpop.xlane.xlu0 %367  ;;  %v602_v20 = vpop.xlane.xlu1 %601 }
 0x174   :  { %v275_v3 = vrot.slane %v274_v61, 4  ;;  %v371_v15 = vcvt.f32.s32 %v368_v38  ;;  %v605_v25 = vcvt.f32.s32 %v602_v20 }
 0x176   :  { %v276_v30 = vadd.s32 %v275_v3, %v274_v61  ;;  %v374_v0 = vadd.s32 %v373_v50, %v371_v15 }
 0x177   :  { %v495_v2 = vpop.xlane.xlu0 %494 }
 0x178   :  { %v375_v31 = vrot.slane %v374_v0, 4  ;;  %v498_v6 = vcvt.f32.s32 %v495_v2  ;;  %v277_v57 = vrot.slane %v276_v30, 2 }
 0x17a   :  { %v376_v12 = vadd.s32 %v375_v31, %v374_v0  ;;  %v501_v24 = vadd.s32 %v500_v29, %v498_v6  ;;  %v278_v26 = vadd.s32 %v277_v57, %v276_v30 }
 0x17b   :  { %v604_v56 = vpop.xlane.xlu0 %603 }
 0x17c   :  { %v502_v16 = vrot.slane %v501_v24, 4  ;;  %v606_v37 = vcvt.f32.s32 %v604_v56  ;;  %v279_v60 = vrot.slane %v278_v26, 1  ;;  %v377_v13 = vrot.slane %v376_v12, 2 }
 0x17e   :  { %v503_v43 = vadd.s32 %v502_v16, %v501_v24  ;;  %v607_v19 = vshll.u32 %v606_v37, 16  ;;  %v280_v39 = vadd.s32 %v279_v60, %v278_v26  ;;  %v378_v8 = vadd.s32 %v377_v13, %v376_v12 }
 0x17f   :  { %v566_v63 = vpop.xlane.xlu0 %565 }
 0x180   :  { %v608_v1 = vadd.s32 %v607_v19, %v605_v25  ;;  %v569_v40 = vcvt.f32.s32 %v566_v63  ;;  %863 = vpush %v280_v39  ;;  %v379_v21 = vrot.slane %v378_v8, 1  ;;  %v504_v58 = vrot.slane %v503_v43, 2 }
 0x182   :  { %v609_v22 = vrot.slane %v608_v1, 4  ;;  %v572_v32 = vadd.s32 %v571_v14, %v569_v40  ;;  %v380_v17 = vadd.s32 %v379_v21, %v378_v8  ;;  %v505_v23 = vadd.s32 %v504_v58, %v503_v43 }
 0x183   :  { %v815_v28 = vpop.xlane.xlu0 %814 }
 0x184   :  { %v610_v48 = vadd.s32 %v609_v22, %v608_v1  ;;  %v573_v59 = vrot.slane %v572_v32, 4  ;;  %v818_v45 = vcvt.f32.s32 %v815_v28  ;;  %865 = vpush %v380_v17  ;;  %v506_v46 = vrot.slane %v505_v23, 1 }
 0x185   :  { %867 = vpush %v472_v42 }
 0x186   :  { %v574_v54 = vadd.s32 %v573_v59, %v572_v32  ;;  %v821_v55 = vadd.s32 %v820_v41, %v818_v45  ;;  %v507_v27 = vadd.s32 %v506_v46, %v505_v23  ;;  %v611_v7 = vrot.slane %v610_v48, 2 }
 0x188   :  { %v822_v11 = vrot.slane %v821_v55, 4  ;;  %869 = vpush %v507_v27  ;;  %v575_v9 = vrot.slane %v574_v54, 2  ;;  %v612_v53 = vadd.s32 %v611_v7, %v610_v48 }
 0x189   :  { %871 = vpush %v542_v52 }
 0x18a   :  { %v823_v61 = vadd.s32 %v822_v11, %v821_v55  ;;  %v576_v33 = vadd.s32 %v575_v9, %v574_v54  ;;  %v613_v49 = vrot.slane %v612_v53, 1 }
 0x18c   :  { %v577_v38 = vrot.slane %v576_v33, 1  ;;  %v824_v50 = vrot.slane %v823_v61, 2  ;;  %v614_v51 = vadd.s32 %v613_v49, %v612_v53 }
 0x18e   :  { %v578_v44 = vadd.s32 %v577_v38, %v576_v33  ;;  %v825_v3 = vadd.s32 %v824_v50, %v823_v61 }
 0x190   :  { %873 = vpush %v578_v44  ;;  %v826_v15 = vrot.slane %v825_v3, 1 }
 0x191   :  { %875 = vpush %v614_v51 }
 0x192   :  { %v827_v30 = vadd.s32 %v826_v15, %v825_v3 }
 0x194   :  { %877 = vpush %v827_v30 }
 0x1b1   :  { %s864_s13 = spop %863 }
 0x1b2   :  { %s282_s19 = sadd.s32 %s864_s13, %s230_s17 }
 0x1b3   :  { %s830_s21 = smul.u32 3, %s282_s19 }
 0x1b5   :  { %s866_s15 = spop %865  ;;  %s831_s3 = ssub.s32 %s853_s28, %s830_s21 }
 0x1b6   :  { %s868_s16 = spop %867 }
 0x1b7   :  { %s833_s30 = sadd.s32 %s868_s16, %s866_s15 }
 0x1b9   :  { %s870_s18 = spop %869 }
 0x1ba   :  { %s872_s20 = spop %871 }
 0x1bb   :  { %s544_s22 = sadd.s32 %s872_s20, %s870_s18 }
 0x1c1   :  { %s874_s23 = spop %873 }
 0x1c2   :  { %s580_s24 = sadd.s32 %s874_s23, %s544_s22  ;;  %s876_s25 = spop %875 }
 0x1c3   :  { %s616_s29 = sadd.s32 %s876_s25, %s580_s24 }
 0x1c4   :  { %s832_s5 = sadd.s32 %s831_s3, %s616_s29 }
 0x1c5   :  { %s878_s2 = spop %877 }
 0x1c6   :  { %s834_s4 = sadd.s32 %s878_s2, %s833_s30 }
 0x1c7   :  { %s854_s6 = sshll.u32 %s834_s4, 1 }
 0x1c8   :  { %s836_s7 = ssub.s32 %s832_s5, %s854_s6 }
 0x1c9   :  { %v837_v0 = vstv %s836_s7 }
 0x1ca   :  { %838 = vst [vmem:[#allocation2] sm:$0x1] %v837_v0 }
 0x1cb   :  { %893 = shalt.err (!%p890_p4)
}
 0x1cc   :  { %s894_s11 = scalar_lea.hbm %s1607_s1, 16 }
 0x1cd   :  { %p895_p5 = scmp.ne.s32.totalorder %s1607_s1, %s894_s11  ;;  %p898_p6 = scmp.lt.u32.totalorder %s894_s11, %s1607_s1 }
 0x1cf   :  { %p900_p7 = pnand %p898_p6, %p895_p5 }
 0x1d1   :  { %903 = shalt.err (!%p900_p7)
}
 0x1d2   :  { %848 = dma.vmem_to_hbm [thread:$0]  %s846_s27, 16, %s1607_s1, [#allocation3]  }
 0x1d3   :  { %904 = dma.done.wait [#allocation3], 16  }
 0x1d4   :  { %905 = vsyncadd [#allocation3], 4294967280 }
 0x1d5   :  { %852 = vsyncpa [#allocation3], 1 }

</bundles_post_ra>
